<compile_context>
chip_gen: v5e
topology: v5e:2x2
jax: 0.10.0
libtpu: 0.0.40
codegen_flags: <defaults>
</compile_context>

<pallas_src>
import jax
import jax.numpy as jnp
from jax.experimental import pallas as pl
from jax.experimental.pallas import tpu as pltpu

LANE = 1024                    # lane-dense slab width (multiple of 128)
MAX_TM = 1024                  # (1024, 1024) f32 block = 4 MiB (v7x-safe cap)
VMEM_CAP = 32 * 1024 * 1024    # never request more than v7x's scoped default


def linear_kernel(w_ref, b_ref, x_ref, o_ref):
    # w_ref, b_ref: (1,) SMEM scalars, read once.
    # x_ref, o_ref: (tm, LANE) lane-dense VMEM tiles -> unmasked full-vreg vst.
    o_ref[...] = x_ref[...] * w_ref[0] + b_ref[0]


def linear_forward(x, weight, bias):
    """y = x @ W^T + b for nn.Linear(1, 1). x: (N, 1), weight: (1, 1), bias: (1,)."""
    n, f = x.shape
    assert f == 1
    w = weight.reshape(-1)   # (1,)
    b = bias.reshape(-1)     # (1,)

    # --- lane-dense repack: (N, 1) -> (rows, LANE) slab ---------------------
    rows = -(-n // LANE)            # ceil(N / LANE)
    pad = rows * LANE - n           # 0 when N is LANE-aligned (fast path)

    flat = x.reshape(-1)
    if pad:                          # static branch: only ragged N pays the pad
        flat = jnp.pad(flat, (0, pad))
    slab = flat.reshape(rows, LANE)  # free (bitcast-style) when pad == 0

    # Tile height: whole-array block for small inputs (block == full dims is
    # always legal, any row count); otherwise 1024-row (4 MiB) blocks with the
    # ragged last block masked by Pallas via grid = cdiv(rows, tm).
    tm = rows if rows <= MAX_TM else MAX_TM
    grid = (pl.cdiv(rows, tm),)

    itemsize = slab.dtype.itemsize
    block_bytes = tm * LANE * itemsize
    vmem_limit = min(VMEM_CAP, max(6 * block_bytes, 8 * 1024 * 1024))
    total = rows * LANE

    out_slab = pl.pallas_call(
        linear_kernel,
        out_shape=jax.ShapeDtypeStruct((rows, LANE), x.dtype),
        grid=grid,
        in_specs=[
            pl.BlockSpec(memory_space=pltpu.SMEM),        # weight scalar
            pl.BlockSpec(memory_space=pltpu.SMEM),        # bias scalar
            pl.BlockSpec((tm, LANE), lambda i: (i, 0)),   # x slab tile
        ],
        out_specs=pl.BlockSpec((tm, LANE), lambda i: (i, 0)),
        compiler_params=pltpu.CompilerParams(
            dimension_semantics=("parallel",),            # shards TCs on v7x
            vmem_limit_bytes=vmem_limit,
        ),
        cost_estimate=pl.CostEstimate(
            flops=2 * total,
            transcendentals=0,
            bytes_accessed=2 * total * itemsize,
        ),
    )(w, b, slab)

    if pad:
        # Strip the padded tail (tail elements evaluate to b; dropped here).
        return out_slab.reshape(-1)[:n].reshape(n, 1)
    return out_slab.reshape(n, 1)   # zero-copy path for LANE-aligned N


if __name__ == "__main__":
    key = jax.random.PRNGKey(0)
    kw, kb, k1, k2, k3 = jax.random.split(key, 5)

    # nn.Linear(1, 1) parameters: weight (1, 1), bias (1,).
    weight = jax.random.uniform(kw, (1, 1), dtype=jnp.float32, minval=-1.0, maxval=1.0)
    bias = jax.random.uniform(kb, (1,), dtype=jnp.float32, minval=-1.0, maxval=1.0)

    # Small batch of scalar inputs, shape (N, 1) like torch Linear expects.
    x1 = jax.random.normal(k1, (8, 1), dtype=jnp.float32)
    y1 = jax.block_until_ready(linear_forward(x1, weight, bias))
    assert y1.shape == (8, 1)
    assert jnp.allclose(y1, x1 * weight[0, 0] + bias[0], atol=1e-6), "mismatch (N=8)"

    # Ragged N: exercises the pad + whole-array-block path.
    x2 = jax.random.normal(k2, (2500, 1), dtype=jnp.float32)
    y2 = jax.block_until_ready(linear_forward(x2, weight, bias))
    assert y2.shape == (2500, 1)
    assert jnp.allclose(y2, x2 * weight[0, 0] + bias[0], atol=1e-6), "mismatch (N=2500)"

    # LANE-aligned N: exercises the zero-copy (no pad / no slice) fast path.
    x3 = jax.random.normal(k3, (4096, 1), dtype=jnp.float32)
    y3 = jax.block_until_ready(linear_forward(x3, weight, bias))
    assert y3.shape == (4096, 1)
    assert jnp.allclose(y3, x3 * weight[0, 0] + bias[0], atol=1e-6), "mismatch (N=4096)"

    print("KERNEL_OK")
</pallas_src>

<mosaic_0001>
module attributes {stable_mosaic.version = 11 : i64} {
  func.func @linear_kernel(%arg0: i32, %arg1: memref<1xf32, #tpu.memory_space<smem>>, %arg2: memref<1xf32, #tpu.memory_space<smem>>, %arg3: memref<1x1024xf32, #tpu.memory_space<vmem>>, %arg4: memref<1x1024xf32, #tpu.memory_space<vmem>>) attributes {dimension_semantics = [#tpu.dimension_semantics<parallel>], iteration_bounds = array<i64: 1>, scalar_prefetch = 0 : i64, scratch_operands = 0 : i64, tpu.core_type = #tpu.core_type<tc>, window_params = [{transform_indices = @transform_0, window_bounds = array<i64: 1>}, {transform_indices = @transform_1, window_bounds = array<i64: 1>}, {transform_indices = @transform_2, window_bounds = array<i64: 1, 1024>}, {transform_indices = @transform_3, window_bounds = array<i64: 1, 1024>}]} {
    %c0 = arith.constant 0 : index
    %c0_0 = arith.constant 0 : index
    %0 = vector.load %arg3[%c0, %c0_0] : memref<1x1024xf32, #tpu.memory_space<vmem>>, vector<1x1024xf32>
    %c0_1 = arith.constant 0 : index
    %1 = memref.load %arg1[%c0_1] : memref<1xf32, #tpu.memory_space<smem>>
    %2 = vector.broadcast %1 : f32 to vector<1x1024xf32>
    %3 = arith.mulf %0, %2 : vector<1x1024xf32>
    %c0_2 = arith.constant 0 : index
    %4 = memref.load %arg2[%c0_2] : memref<1xf32, #tpu.memory_space<smem>>
    %5 = vector.broadcast %4 : f32 to vector<1x1024xf32>
    %6 = arith.addf %3, %5 : vector<1x1024xf32>
    %c0_3 = arith.constant 0 : index
    %c0_4 = arith.constant 0 : index
    %7 = vector.load %arg4[%c0_3, %c0_4] : memref<1x1024xf32, #tpu.memory_space<vmem>>, vector<1x1024xf32>
    tpu.vector_store %arg4[%c0_3, %c0_4], %6 {strides = array<i32>} : memref<1x1024xf32, #tpu.memory_space<vmem>>, vector<1x1024xf32>,
    return
  }
  func.func @transform_0(%arg0: i32) -> i32 {
    %c0_i32 = arith.constant 0 : i32
    %c0_i32_0 = arith.constant 0 : i32
    return %c0_i32 : i32
  }
  func.func @transform_1(%arg0: i32) -> i32 {
    %c0_i32 = arith.constant 0 : i32
    %c0_i32_0 = arith.constant 0 : i32
    return %c0_i32 : i32
  }
  func.func @transform_2(%arg0: i32) -> (i32, i32) {
    %c0_i32 = arith.constant 0 : i32
    %c0_i32_0 = arith.constant 0 : i32
    return %arg0, %c0_i32 : i32, i32
  }
  func.func @transform_3(%arg0: i32) -> (i32, i32) {
    %c0_i32 = arith.constant 0 : i32
    %c0_i32_0 = arith.constant 0 : i32
    return %arg0, %c0_i32 : i32, i32
  }
}

</mosaic_0001>

<bundles_post_ra>
// kernel: tpu_custom_call.1
= control target key start
LH: loop header
LB: loop body
LE: loop exit
PB: predicated region body
PF: predicated region fallthrough
CT: control target
= control target key end

     0   :  { %10 = vsyncpa [#allocation5], 0  ;;  %s144_s0 = inlined_call_operand.<no memory space> [shape: f32[1], index: 0, kind: input, shape index: {}]   ;;  %s145_s1 = inlined_call_operand.<no memory space> [shape: f32[1], index: 1, kind: input, shape index: {}]   ;;  %s146_s2 = inlined_call_operand.hbm [shape: f32[1,1024], index: 2, kind: input, shape index: {}]   ;;  %s147_s3 = inlined_call_operand.hbm [shape: f32[1,1024], index: 3, kind: output, shape index: {}]  }
   0x1   :  { %11 = vsyncpa [#allocation6], 0  ;;  %s21_s14 = sshll.u32 %s146_s2, 4  ;;  %s110_s15 = smov [#allocation4]   ;;  %s22_s14 = int_to_ptr.hbm [resolvable:$true] %s21_s14 }
   0x2   :  { %s23_s16 = sshll.u32 %s110_s15, 4  ;;  %s24_s16 = int_to_ptr.vmem [resolvable:$true] %s23_s16 }
   0x3   :  { %26 = dma.hbm_to_vmem [thread:$0]  %s22_s14, 128, %s24_s16, [#allocation5]  }
   0x4   :  { %106 = dma.done.wait [#allocation5], 128  }
   0x5   :  { %107 = vsyncadd [#allocation5], 4294967168  ;;  %v33_v0 = vstv %s144_s0  ;;  %v31_v1 = vld [vmem:[#allocation4] sm:$0xff]  ;;  %v36_v2 = vstv %s145_s1  ;;  %s111_s21 = smov [#allocation7]   ;;  %s46_s24 = sshll.u32 %s147_s3, 4  ;;  %s47_s24 = int_to_ptr.hbm [resolvable:$true] %s46_s24 }
   0x6   :  { %s44_s22 = sshll.u32 %s111_s21, 4  ;;  %v34_v3 = vmul.f32 %v33_v0, %v31_v1  ;;  %s45_s22 = int_to_ptr.vmem [resolvable:$true] %s44_s22 }
   0x8   :  { %v37_v4 = vadd.f32 %v36_v2, %v34_v3 }
   0xa   :  { %38 = vst [vmem:[#allocation7] sm:$0xff] %v37_v4 }
   0xb   :  { %49 = dma.vmem_to_hbm [thread:$0]  %s45_s22, 128, %s47_s24, [#allocation6]  }
   0xc   :  { %108 = dma.done.wait [#allocation6], 128  }
   0xd   :  { %109 = vsyncadd [#allocation6], 4294967168 }
   0xe   :  { %54 = vsyncpa [#allocation5], 1 }
   0xf   :  { %55 = vsyncpa [#allocation6], 1 }

</bundles_post_ra>
